<compile_context>
chip_gen: v6e
topology: v6e:2x2x1
jax: 0.10.0
libtpu: 0.0.40
codegen_flags: <defaults>
</compile_context>

<pallas_src>
import functools

import jax
import jax.numpy as jnp
from jax import lax
from jax.experimental import pallas as pl
from jax.experimental.pallas import tpu as pltpu

EPS = 1e-6
DROPOUT_P = 0.1        # eval-mode => identity
_MAX_TM = 1024         # ~512-1024 rows hits the HBM roofline
_MIN_GRID_STEPS = 4    # >=2 per TensorCore on v7x + something to pipeline


def _round_up(x, m):
    return ((x + m - 1) // m) * m


def _vmem_budgets():
    """(tile-sizing budget, vmem_limit_bytes) — generation aware."""
    cap = None
    try:
        cap = int(pltpu.get_tpu_info().vmem_capacity_bytes)
    except Exception:
        cap = None
    if cap is None or cap <= 0:
        cap = 64 * 1024 * 1024                    # assume the smallest (v7x)
    if cap >= 128 * 1024 * 1024:                  # v5e / v6e: 128 MiB physical
        return 96 * 1024 * 1024, 110 * 1024 * 1024
    return 40 * 1024 * 1024, 48 * 1024 * 1024     # v7x: 64 MiB physical


def _pick_tm(m_rows, d_pad, x_itemsize, out_itemsize, w_itemsize, budget):
    """Largest row-tile (multiple of 8) whose working set fits the VMEM budget."""
    # Grid-invariant residents: W + bias, single-buffered (pl.Buffered(1)).
    resident = d_pad * d_pad * w_itemsize + d_pad * 4
    avail = budget - resident
    if avail <= 0:
        # TODO(synk): for d_model where the (D, D) weight cannot be VMEM
        # resident, restructure as a standard (M//tm, N//tn, K//tk) tiled
        # matmul with an f32 accumulator scratch.
        raise ValueError("d_model too large for the resident-weight strategy")
    # Per-row bytes: x (2 pipeline buffers) + out (2 buffers) + ~2 f32
    # temporaries (diff / y); the f32 x copy is not live across the matmul.
    per_row = d_pad * (2 * x_itemsize + 2 * out_itemsize + 2 * 4)
    tm = int(min(avail // per_row, _MAX_TM))
    # Cap so the grid has >= ~_MIN_GRID_STEPS steps (megacore + pipelining).
    tm_cap = max(8, _round_up(-(-m_rows // _MIN_GRID_STEPS), 8))
    tm = min(tm, tm_cap, _round_up(m_rows, 8))
    tm = max(8, (tm // 8) * 8)
    return tm


def _residual_kernel(scale_ref, x_ref, w_ref, b_ref, o_ref, *, d):
    # scale_ref: (1,) f32 in SMEM (= alpha*beta/eps, folded on the host)
    # x_ref: (tm, Dp)   w_ref: (Dp, Dp) bf16   b_ref: (1, Dp) f32   o_ref: (tm, Dp)
    dp = x_ref.shape[-1]
    x = x_ref[...].astype(jnp.float32)

    # --- LayerNormalization (reference semantics; stats over the TRUE d) ---
    mean = jnp.sum(x, axis=-1, keepdims=True) * (1.0 / d)
    diff = x - mean
    if dp != d:
        # Zero the lane-padding columns so they don't pollute the variance
        # (and so `normed` is exactly zero there).
        lane = lax.broadcasted_iota(jnp.int32, (1, dp), 1)
        diff = jnp.where(lane < d, diff, 0.0)
    var = jnp.sum(diff * diff, axis=-1, keepdims=True) * (1.0 / (d - 1))
    inv_std = lax.rsqrt(var)                  # EUP slot; == 1/std (torch ddof=1)
    # alpha*(x-mean)/(std*eps)*beta == diff * (1/std) * (alpha*beta/eps)
    normed = diff * (inv_std * scale_ref[0])  # single full-tile VPU multiply

    # --- sublayer: dense linear on the MXU (bf16 operands, f32 accumulate) ---
    y = jnp.dot(normed.astype(w_ref.dtype), w_ref[...],
                preferred_element_type=jnp.float32)
    y = y + b_ref[...]

    # --- dropout (eval mode -> identity) + residual add ---
    # Re-read x_ref so the f32 copy of x is not live across the MXU section.
    o_ref[...] = (x_ref[...].astype(jnp.float32) + y).astype(o_ref.dtype)


def prepare_params(w, b, alpha, beta, *, eps=EPS, mxu_dtype=jnp.bfloat16):
    """One-time (per model) padding / casting of the sublayer weights.

    Returns (w_p, b_p, scale) to pass to residual_connection. Doing this once
    outside the hot path avoids re-reading the f32 (D, D) weight and writing
    a bf16 copy on every invocation.
    """
    w = jnp.asarray(w)
    D = w.shape[0]
    Dp = _round_up(D, 128)
    b = jnp.asarray(b).reshape(1, -1)             # accept (D,) or (1, D)
    if Dp != D:
        w = jnp.pad(w, ((0, Dp - D), (0, Dp - D)))
        b = jnp.pad(b, ((0, 0), (0, Dp - D)))
    # bf16 weights: half the resident VMEM / HBM traffic, native MXU operand
    # dtype. Pass mxu_dtype=jnp.float32 if full precision is required.
    w = w.astype(mxu_dtype)
    b = b.astype(jnp.float32)
    scale = (jnp.asarray(alpha, jnp.float32).reshape(-1)[:1]
             * jnp.asarray(beta, jnp.float32).reshape(-1)[:1]
             * jnp.float32(1.0 / eps))            # one SMEM scalar per step
    return w, b, scale


def _const_spec(block_shape, single_buffer):
    """BlockSpec for a grid-invariant operand (W / bias)."""
    ndim = len(block_shape)
    index_map = lambda i, *_: (0,) * ndim
    if single_buffer:
        # Grid-invariant: one VMEM buffer instead of a double buffer.
        return pl.BlockSpec(block_shape, index_map, pipeline_mode=pl.Buffered(1))
    return pl.BlockSpec(block_shape, index_map)


def residual_connection(x, w_p, b_p, scale, *, tm=None):
    """x: [B, S, D]; (w_p, b_p, scale) from prepare_params.

    Returns x + Linear(LayerNorm(x)) with eval-mode (identity) dropout.
    """
    B, S, D = x.shape
    M = B * S
    Dp = w_p.shape[0]

    x2 = x.reshape(M, D)
    if Dp != D:
        # Lane-pad the feature dim only. No row padding: the ragged last row
        # tile is handled by the cdiv grid + Pallas' masked writeback.
        x2 = jnp.pad(x2, ((0, 0), (0, Dp - D)))

    budget, vmem_limit = _vmem_budgets()
    if tm is None:
        tm = _pick_tm(M, Dp, x2.dtype.itemsize, x2.dtype.itemsize,
                      w_p.dtype.itemsize, budget)
    tm = max(8, (min(int(tm), _round_up(M, 8)) // 8) * 8)
    grid_m = pl.cdiv(M, tm)

    kernel = functools.partial(_residual_kernel, d=D)

    def _call(single_buffer):
        return pl.pallas_call(
            kernel,
            out_shape=jax.ShapeDtypeStruct((M, Dp), x.dtype),
            grid_spec=pltpu.PrefetchScalarGridSpec(
                num_scalar_prefetch=1,                         # folded LN scale
                grid=(grid_m,),
                in_specs=[
                    pl.BlockSpec((tm, Dp), lambda i, *_: (i, 0)),   # x rows
                    _const_spec((Dp, Dp), single_buffer),           # W (resident)
                    _const_spec((1, Dp), single_buffer),            # bias
                ],
                out_specs=pl.BlockSpec((tm, Dp), lambda i, *_: (i, 0)),
            ),
            compiler_params=pltpu.CompilerParams(
                dimension_semantics=("parallel",),   # megacore-shard the rows
                vmem_limit_bytes=vmem_limit,
            ),
        )(scale, x2, w_p, b_p)

    try:
        out2 = _call(True)          # W/bias single-buffered
    except Exception:
        out2 = _call(False)         # fallback: plain (double-buffered) specs

    if Dp != D:
        out2 = out2[:, :D]
    return out2.reshape(B, S, D)


def _reference(x, w, b, alpha, beta, eps=EPS):
    """Pure-JAX f32 reference matching the PyTorch module (incl. its quirks)."""
    x32 = x.astype(jnp.float32)
    mean = jnp.mean(x32, axis=-1, keepdims=True)
    diff = x32 - mean
    var = jnp.sum(diff * diff, axis=-1, keepdims=True) / (x.shape[-1] - 1)
    std = jnp.sqrt(var)
    normed = alpha[0] * diff / (std * eps) * beta[0]
    y = normed @ w.astype(jnp.float32) + jnp.asarray(b, jnp.float32).reshape(1, -1)
    return (x32 + y).astype(x.dtype)


if __name__ == "__main__":
    key = jax.random.PRNGKey(0)

    def run_case(B, S, D, tm=None, x_dtype=jnp.float32, tol=2e-2):
        case_key = jax.random.fold_in(key, B * 100000 + S * 1000 + D)
        kx, kw, kb = jax.random.split(case_key, 3)
        x = jax.random.normal(kx, (B, S, D), dtype=jnp.float32).astype(x_dtype)
        alpha = jnp.ones((1,), dtype=jnp.float32)   # LayerNormalization.alpha
        beta = jnp.ones((1,), dtype=jnp.float32)    # LayerNormalization.beta
        w = jax.random.normal(kw, (D, D), dtype=jnp.float32) * 0.02
        b = jax.random.normal(kb, (1, D), dtype=jnp.float32) * 0.02

        w_p, b_p, scale = prepare_params(w, b, alpha, beta)
        out = residual_connection(x, w_p, b_p, scale, tm=tm)
        out = jax.block_until_ready(out)
        ref = _reference(x, w, b, alpha, beta)

        assert out.shape == (B, S, D)
        assert out.dtype == x.dtype
        # Relative max-norm check (outputs are amplified ~1/eps by the
        # reference's std*eps quirk, so a plain atol is meaningless).
        o32 = out.astype(jnp.float32)
        r32 = ref.astype(jnp.float32)
        err = float(jnp.max(jnp.abs(o32 - r32)) / (jnp.max(jnp.abs(r32)) + 1e-30))
        assert err < tol, f"relative error too large: {err}"

    # Small shape consistent with the module (batch=2, seq=8, d_model=32):
    # exercises lane padding (32 -> 128) and the auto row-tile picker.
    run_case(2, 8, 32)
    # Ragged M handled purely by the cdiv grid (no wrapper row-pad / slice
    # copies), lane padding, and a multi-step pipelined "parallel" grid.
    run_case(2, 100, 96, tm=64)
    # Lane-aligned d_model: no padding or output slicing anywhere.
    run_case(2, 16, 128)
    # bf16 activations: halves the dominant x-read / out-write HBM bytes.
    run_case(2, 16, 128, x_dtype=jnp.bfloat16, tol=5e-2)

    print("KERNEL_OK")
</pallas_src>

<mosaic_0001>
module attributes {stable_mosaic.version = 11 : i64} {
  func.func @_residual_kernel(%arg0: i32, %arg1: memref<1xf32, #tpu.memory_space<smem>>, %arg2: memref<8x128xf32, #tpu.memory_space<vmem>>, %arg3: memref<128x128xbf16, #tpu.memory_space<vmem>>, %arg4: memref<1x128xf32, #tpu.memory_space<vmem>>, %arg5: memref<8x128xf32, #tpu.memory_space<vmem>>) attributes {dimension_semantics = [#tpu.dimension_semantics<parallel>], iteration_bounds = array<i64: 2>, scalar_prefetch = 1 : i64, scratch_operands = 0 : i64, tpu.core_type = #tpu.core_type<tc>, window_params = [{transform_indices = @transform_0, window_bounds = array<i64: 8, 128>}, {pipeline_mode = #tpu.pipeline_mode<synchronous>, transform_indices = @transform_1, window_bounds = array<i64: 128, 128>}, {pipeline_mode = #tpu.pipeline_mode<synchronous>, transform_indices = @transform_2, window_bounds = array<i64: 1, 128>}, {transform_indices = @transform_3, window_bounds = array<i64: 8, 128>}]} {
    %c0 = arith.constant 0 : index
    %c0_0 = arith.constant 0 : index
    %0 = vector.load %arg2[%c0, %c0_0] : memref<8x128xf32, #tpu.memory_space<vmem>>, vector<8x128xf32>
    %cst = arith.constant dense<0.000000e+00> : vector<8xf32>
    %1 = vector.multi_reduction <add>, %0, %cst [1] : vector<8x128xf32> to vector<8xf32>
    %2 = vector.shape_cast %1 : vector<8xf32> to vector<8x1xf32>
    %cst_1 = arith.constant 3.125000e-02 : f32
    %3 = vector.broadcast %cst_1 : f32 to vector<8x1xf32>
    %4 = arith.mulf %2, %3 : vector<8x1xf32>
    %5 = vector.broadcast %4 : vector<8x1xf32> to vector<8x128xf32>
    %6 = arith.subf %0, %5 : vector<8x128xf32>
    %7 = tpu.iota {dimensions = array<i32: 1>} : vector<1x128xi32>
    %c32_i32 = arith.constant 32 : i32
    %8 = vector.broadcast %c32_i32 : i32 to vector<1x128xi32>
    %9 = arith.cmpi slt, %7, %8 : vector<1x128xi32>
    %cst_2 = arith.constant 0.000000e+00 : f32
    %10 = vector.shape_cast %9 : vector<1x128xi1> to vector<1x128xi1>
    %11 = vector.broadcast %10 : vector<1x128xi1> to vector<8x128xi1>
    %12 = vector.broadcast %cst_2 : f32 to vector<8x128xf32>
    %13 = arith.select %11, %6, %12 : vector<8x128xi1>, vector<8x128xf32>
    %14 = arith.mulf %13, %13 : vector<8x128xf32>
    %cst_3 = arith.constant dense<0.000000e+00> : vector<8xf32>
    %15 = vector.multi_reduction <add>, %14, %cst_3 [1] : vector<8x128xf32> to vector<8xf32>
    %16 = vector.shape_cast %15 : vector<8xf32> to vector<8x1xf32>
    %cst_4 = arith.constant 0.0322580636 : f32
    %17 = vector.broadcast %cst_4 : f32 to vector<8x1xf32>
    %18 = arith.mulf %16, %17 : vector<8x1xf32>
    %19 = math.rsqrt %18 : vector<8x1xf32>
    %c0_5 = arith.constant 0 : index
    %20 = memref.load %arg1[%c0_5] : memref<1xf32, #tpu.memory_space<smem>>
    %21 = vector.broadcast %20 : f32 to vector<8x1xf32>
    %22 = arith.mulf %19, %21 : vector<8x1xf32>
    %23 = vector.broadcast %22 : vector<8x1xf32> to vector<8x128xf32>
    %24 = arith.mulf %13, %23 : vector<8x128xf32>
    %25 = arith.truncf %24 : vector<8x128xf32> to vector<8x128xbf16>
    %c0_6 = arith.constant 0 : index
    %c0_7 = arith.constant 0 : index
    %26 = vector.load %arg3[%c0_6, %c0_7] : memref<128x128xbf16, #tpu.memory_space<vmem>>, vector<128x128xbf16>
    %cst_8 = arith.constant dense<0.000000e+00> : vector<8x128xf32>
    %27 = tpu.matmul %25, %26, %cst_8 {dimension_numbers = #tpu.dot_dimension_numbers<[1], [0], [0], [1], [0, 0, 1, 1], [], []>} : vector<8x128xbf16>, vector<128x128xbf16>, vector<8x128xf32> -> vector<8x128xf32>
    %c0_9 = arith.constant 0 : index
    %c0_10 = arith.constant 0 : index
    %28 = vector.load %arg4[%c0_9, %c0_10] : memref<1x128xf32, #tpu.memory_space<vmem>>, vector<1x128xf32>
    %29 = vector.broadcast %28 : vector<1x128xf32> to vector<8x128xf32>
    %30 = arith.addf %27, %29 : vector<8x128xf32>
    %c0_11 = arith.constant 0 : index
    %c0_12 = arith.constant 0 : index
    %31 = vector.load %arg2[%c0_11, %c0_12] : memref<8x128xf32, #tpu.memory_space<vmem>>, vector<8x128xf32>
    %32 = arith.addf %31, %30 : vector<8x128xf32>
    %c0_13 = arith.constant 0 : index
    %c0_14 = arith.constant 0 : index
    %33 = vector.load %arg5[%c0_13, %c0_14] : memref<8x128xf32, #tpu.memory_space<vmem>>, vector<8x128xf32>
    tpu.vector_store %arg5[%c0_13, %c0_14], %32 {strides = array<i32>} : memref<8x128xf32, #tpu.memory_space<vmem>>, vector<8x128xf32>,
    return
  }
  func.func @transform_0(%arg0: i32, %arg1: memref<1xf32, #tpu.memory_space<smem>>) -> (i32, i32) {
    %c0_i32 = arith.constant 0 : i32
    %c0_i32_0 = arith.constant 0 : i32
    return %arg0, %c0_i32 : i32, i32
  }
  func.func @transform_1(%arg0: i32, %arg1: memref<1xf32, #tpu.memory_space<smem>>) -> (i32, i32) {
    %c0_i32 = arith.constant 0 : i32
    %c0_i32_0 = arith.constant 0 : i32
    %c0_i32_1 = arith.constant 0 : i32
    return %c0_i32, %c0_i32_0 : i32, i32
  }
  func.func @transform_2(%arg0: i32, %arg1: memref<1xf32, #tpu.memory_space<smem>>) -> (i32, i32) {
    %c0_i32 = arith.constant 0 : i32
    %c0_i32_0 = arith.constant 0 : i32
    %c0_i32_1 = arith.constant 0 : i32
    return %c0_i32, %c0_i32_0 : i32, i32
  }
  func.func @transform_3(%arg0: i32, %arg1: memref<1xf32, #tpu.memory_space<smem>>) -> (i32, i32) {
    %c0_i32 = arith.constant 0 : i32
    %c0_i32_0 = arith.constant 0 : i32
    return %arg0, %c0_i32 : i32, i32
  }
}

module attributes {stable_mosaic.version = 11 : i64} {
  func.func @_residual_kernel(%arg0: i32, %arg1: memref<1xf32, #tpu.memory_space<smem>>, %arg2: memref<8x128xf32, #tpu.memory_space<vmem>>, %arg3: memref<128x128xbf16, #tpu.memory_space<vmem>>, %arg4: memref<1x128xf32, #tpu.memory_space<vmem>>, %arg5: memref<8x128xf32, #tpu.memory_space<vmem>>) attributes {dimension_semantics = [#tpu.dimension_semantics<parallel>], iteration_bounds = array<i64: 2>, scalar_prefetch = 1 : i64, scratch_operands = 0 : i64, tpu.core_type = #tpu.core_type<tc>, window_params = [{transform_indices = @transform_0, window_bounds = array<i64: 8, 128>}, {pipeline_mode = #tpu.pipeline_mode<synchronous>, transform_indices = @transform_1, window_bounds = array<i64: 128, 128>}, {pipeline_mode = #tpu.pipeline_mode<synchronous>, transform_indices = @transform_2, window_bounds = array<i64: 1, 128>}, {transform_indices = @transform_3, window_bounds = array<i64: 8, 128>}]} {
    %c0 = arith.constant 0 : index
    %c0_0 = arith.constant 0 : index
    %0 = vector.load %arg2[%c0, %c0_0] : memref<8x128xf32, #tpu.memory_space<vmem>>, vector<8x128xf32>
    %cst = arith.constant dense<0.000000e+00> : vector<8xf32>
    %1 = vector.multi_reduction <add>, %0, %cst [1] : vector<8x128xf32> to vector<8xf32>
    %2 = vector.shape_cast %1 : vector<8xf32> to vector<8x1xf32>
    %cst_1 = arith.constant 3.125000e-02 : f32
    %3 = vector.broadcast %cst_1 : f32 to vector<8x1xf32>
    %4 = arith.mulf %2, %3 : vector<8x1xf32>
    %5 = vector.broadcast %4 : vector<8x1xf32> to vector<8x128xf32>
    %6 = arith.subf %0, %5 : vector<8x128xf32>
    %7 = tpu.iota {dimensions = array<i32: 1>} : vector<1x128xi32>
    %c32_i32 = arith.constant 32 : i32
    %8 = vector.broadcast %c32_i32 : i32 to vector<1x128xi32>
    %9 = arith.cmpi slt, %7, %8 : vector<1x128xi32>
    %cst_2 = arith.constant 0.000000e+00 : f32
    %10 = vector.shape_cast %9 : vector<1x128xi1> to vector<1x128xi1>
    %11 = vector.broadcast %10 : vector<1x128xi1> to vector<8x128xi1>
    %12 = vector.broadcast %cst_2 : f32 to vector<8x128xf32>
    %13 = arith.select %11, %6, %12 : vector<8x128xi1>, vector<8x128xf32>
    %14 = arith.mulf %13, %13 : vector<8x128xf32>
    %cst_3 = arith.constant dense<0.000000e+00> : vector<8xf32>
    %15 = vector.multi_reduction <add>, %14, %cst_3 [1] : vector<8x128xf32> to vector<8xf32>
    %16 = vector.shape_cast %15 : vector<8xf32> to vector<8x1xf32>
    %cst_4 = arith.constant 0.0322580636 : f32
    %17 = vector.broadcast %cst_4 : f32 to vector<8x1xf32>
    %18 = arith.mulf %16, %17 : vector<8x1xf32>
    %19 = math.rsqrt %18 : vector<8x1xf32>
    %c0_5 = arith.constant 0 : index
    %20 = memref.load %arg1[%c0_5] : memref<1xf32, #tpu.memory_space<smem>>
    %21 = vector.broadcast %20 : f32 to vector<8x1xf32>
    %22 = arith.mulf %19, %21 : vector<8x1xf32>
    %23 = vector.broadcast %22 : vector<8x1xf32> to vector<8x128xf32>
    %24 = arith.mulf %13, %23 : vector<8x128xf32>
    %25 = arith.truncf %24 : vector<8x128xf32> to vector<8x128xbf16>
    %c0_6 = arith.constant 0 : index
    %c0_7 = arith.constant 0 : index
    %26 = vector.load %arg3[%c0_6, %c0_7] : memref<128x128xbf16, #tpu.memory_space<vmem>>, vector<128x128xbf16>
    %cst_8 = arith.constant dense<0.000000e+00> : vector<8x128xf32>
    %27 = tpu.matmul %25, %26, %cst_8 {dimension_numbers = #tpu.dot_dimension_numbers<[1], [0], [0], [1], [0, 0, 1, 1], [], []>} : vector<8x128xbf16>, vector<128x128xbf16>, vector<8x128xf32> -> vector<8x128xf32>
    %c0_9 = arith.constant 0 : index
    %c0_10 = arith.constant 0 : index
    %28 = vector.load %arg4[%c0_9, %c0_10] : memref<1x128xf32, #tpu.memory_space<vmem>>, vector<1x128xf32>
    %29 = vector.broadcast %28 : vector<1x128xf32> to vector<8x128xf32>
    %30 = arith.addf %27, %29 : vector<8x128xf32>
    %c0_11 = arith.constant 0 : index
    %c0_12 = arith.constant 0 : index
    %31 = vector.load %arg2[%c0_11, %c0_12] : memref<8x128xf32, #tpu.memory_space<vmem>>, vector<8x128xf32>
    %32 = arith.addf %31, %30 : vector<8x128xf32>
    %c0_13 = arith.constant 0 : index
    %c0_14 = arith.constant 0 : index
    %33 = vector.load %arg5[%c0_13, %c0_14] : memref<8x128xf32, #tpu.memory_space<vmem>>, vector<8x128xf32>
    tpu.vector_store %arg5[%c0_13, %c0_14], %32 {strides = array<i32>} : memref<8x128xf32, #tpu.memory_space<vmem>>, vector<8x128xf32>,
    return
  }
  func.func @transform_0(%arg0: i32, %arg1: memref<1xf32, #tpu.memory_space<smem>>) -> (i32, i32) {
    %c0_i32 = arith.constant 0 : i32
    %c0_i32_0 = arith.constant 0 : i32
    return %arg0, %c0_i32 : i32, i32
  }
  func.func @transform_1(%arg0: i32, %arg1: memref<1xf32, #tpu.memory_space<smem>>) -> (i32, i32) {
    %c0_i32 = arith.constant 0 : i32
    %c0_i32_0 = arith.constant 0 : i32
    %c0_i32_1 = arith.constant 0 : i32
    return %c0_i32, %c0_i32_0 : i32, i32
  }
  func.func @transform_2(%arg0: i32, %arg1: memref<1xf32, #tpu.memory_space<smem>>) -> (i32, i32) {
    %c0_i32 = arith.constant 0 : i32
    %c0_i32_0 = arith.constant 0 : i32
    %c0_i32_1 = arith.constant 0 : i32
    return %c0_i32, %c0_i32_0 : i32, i32
  }
  func.func @transform_3(%arg0: i32, %arg1: memref<1xf32, #tpu.memory_space<smem>>) -> (i32, i32) {
    %c0_i32 = arith.constant 0 : i32
    %c0_i32_0 = arith.constant 0 : i32
    return %arg0, %c0_i32 : i32, i32
  }
}

</mosaic_0001>

<bundles_post_ra>
// kernel: tpu_custom_call.1
= control target key start
LH: loop header
LB: loop body
LE: loop exit
PB: predicated region body
PF: predicated region fallthrough
CT: control target
= control target key end

     0   :  { %s887_s0 = inlined_call_operand.<no memory space> [shape: f32[1], index: 0, kind: input, shape index: {}]   ;;  %s888_s1 = inlined_call_operand.hbm [shape: f32[16,128], index: 1, kind: input, shape index: {}]   ;;  %s889_s2 = inlined_call_operand.hbm [shape: bf16[128,128], index: 2, kind: input, shape index: {}]   ;;  %s890_s3 = inlined_call_operand.vmem [shape: f32[1,128], index: 3, kind: input, shape index: {}]   ;;  %s891_s4 = inlined_call_operand.hbm [shape: f32[16,128], index: 4, kind: output, shape index: {}]  }
   0x1   :  { %9 = sst [smem:[#allocation3]] %s887_s0 }
   0x2   :  { %10 = vsyncpa [#allocation5], 0 }
   0x3   :  { %12 = vsyncpa [#allocation5 + $0x1], 0 }
   0x4   :  { %13 = vsyncpa [#allocation8], 0 }
   0x5   :  { %14 = vsyncpa [#allocation6], 0 }
   0x6   :  { %16 = vsyncpa [#allocation6 + $0x1], 0  ;;  %s714_s17 = smov 0   ;;  %s716_s18 = smov 0  }
   0x7   :  { %s718_s19 = smov 0   ;;  %s720_s20 = smov 0  }
   0x8 LB: > { %s735_s0 = sadd.s32 4294967295, %s677_s20   ;;  %s432_s21 = sadd.s32 4294967294, %s677_s20   ;;  %s677_s20 = sphi %s720_s20, %s913_s20   ;;  %s673_s19 = sphi %s718_s19, %s912_s19   ;;  %s669_s18 = sphi %s716_s18, %s911_s18   ;;  %s665_s17 = sphi %s714_s17, %s910_s17  }
   0x9   : > { %p42_p0 = scmp.ne.s32.totalorder %s669_s18, %s665_s17  ;;  %p892_p1 = scmp.eq.s32.totalorder %s735_s0, 0 }
   0xa   : > { %p114_p3 = scmp.eq.s32.totalorder %s432_s21, 1  ;;  %p433_p5 = scmp.ge.s32.totalorder %s677_s20, 1 }
   0xb   : > { %p744_p4 = por %p892_p1, %p42_p0  ;;  %p121_p7 = scmp.lt.s32.totalorder %s677_s20, 3 }
   0xc   : > { %p749_p6 = por %p114_p3, %p42_p0  ;;  %s679_s25 = smov [#allocation7]  }
   0xd   : > { %s896_s22 = scalar_select %p744_p4, 1, 0 }
   0xe   : > { %s897_s23 = scalar_select %p749_p6, 1, 0 }
   0xf   : > { %p754_p8 = pnand %p433_p5, %p121_p7  ;;  %s133_s26 = sshll.u32 %s679_s25, 4  ;;  %s134_s26 = int_to_ptr.vmem [resolvable:$true] %s133_s26 }
  0x10   : > { %s768_s28 = sadd.s32 1, %s677_s20   ;;  %s29_s29 = sadd.s32 1, %s673_s19 }
  0x11   : > { %s898_s24 = scalar_select %p754_p8, 1, 0 }
  0x12   : > { %p492_p9 = pneg %p754_p8  ;;  %s26_s30 = ssub.s32 %s677_s20, %s768_s28 }
  0x13   : > { %s566_s5 = scalar_lea.vmem %s134_s26, 1024  ;;  %p574_p5 = scmp.lt.s32.totalorder %s134_s26, %s134_s26 }
  0x14   : > { %p763_p11 = pnand %p492_p9, %p892_p1  ;;  %p567_p13 = scmp.ne.s32.totalorder %s134_s26, %s566_s5 }
  0x15   : > { %p575_p7 = scmp.lt.s32.totalorder %s566_s5, %s566_s5 }
  0x16   : > { %p557_p12 = pneg %p763_p11 }
  0x17   : > { %p576_p10 = por %p575_p7, %p574_p5 }
  0x18   : > { %p569_p0 = pnand %p567_p13, %p557_p12 }
  0x1a   : > { %p570_p3 = pneg %p569_p0 }
  0x1c   : > { %p577_p2 = pnand %p576_p10, %p570_p3 }
  0x1e   : > { %580 = shalt.err (!%p577_p2)
}
  0x1f   : > { %s680_s6 = smov 64   ;;  %s681_s7 = smov 4  }
  0x20   : > { %495 = dma.hbm_to_vmem [thread:$0]  (!%p763_p11), %s889_s2, 1024, %s134_s26, [#allocation8], %s680_s6, %s680_s6, %s681_s7  }
  0x21   : > { %p27_p9 = scmp.eq.s32.totalorder %s26_s30, 0  ;;  %p36_p12 = scmp.ne.s32.totalorder %s673_s19, %s669_s18 }
  0x22   : > { %p37_p10 = scmp.eq.s32.totalorder %s677_s20, 0  ;;  %p505_p2 = scmp.lt.s32.totalorder %s677_s20, 2 }
  0x23   : > { %s785_s10 = scalar_select %p27_p9, %s673_s19, %s29_s29  }
  0x24   : > { %p38_p13 = por %p37_p10, %p36_p12  ;;  %p900_p0 = scmp.eq.s32.totalorder %s735_s0, 1 }
  0x25   : > { %s150_s12 = sand.u32 1, %s673_s19   ;;  %s437_s13 = sshll.u32 %s677_s20, 7 }
  0x26   : > { %p789_p3 = por %p900_p0, %p36_p12  ;;  %s436_s14 = sshll.u32 %s150_s12, 3 }
  0x27   : > { %s798_s21 = scalar_lea.hbm %s888_s1, %s437_s13  ;;  %s154_s25 = scalar_lea.vmem [#allocation4], %s436_s14 }
  0x28   : > { %s901_s11 = scalar_select %p789_p3, 1, 0 }
  0x29   : > { %s161_s26 = sshll.u32 %s154_s25, 4  ;;  %p800_p11 = pnand %p505_p2, %p38_p13  ;;  %s162_s26 = int_to_ptr.vmem [resolvable:$true] %s161_s26 }
  0x2a   : > { %s151_s29 = scalar_lea.sflag [#allocation5], %s150_s12  ;;  %s581_s30 = scalar_lea.hbm %s798_s21, 128 }
  0x2b   : > { %p582_p5 = scmp.ne.s32.totalorder %s798_s21, %s581_s30  ;;  %p583_p7 = pneg %p800_p11 }
  0x2c   : > { %s586_s7 = scalar_lea.hbm %s888_s1, 256  ;;  %p587_p10 = scmp.lt.s32.totalorder %s798_s21, %s888_s1 }
  0x2d   : > { %p584_p9 = pnand %p583_p7, %p582_p5  ;;  %p588_p2 = scmp.lt.s32.totalorder %s586_s7, %s581_s30 }
  0x2f   : > { %p585_p12 = pneg %p584_p9  ;;  %p589_p13 = por %p588_p2, %p587_p10 }
  0x31   : > { %p590_p0 = pnand %p589_p13, %p585_p12 }
  0x33   : > { %593 = shalt.err (!%p590_p0)
}
  0x34   : > { %s594_s13 = scalar_lea.vmem %s162_s26, 128  ;;  %s682_s12 = smov [#allocation4]  }
  0x35   : > { %p595_p1 = scmp.ne.s32.totalorder %s162_s26, %s594_s13  ;;  %s599_s14 = sshll.u32 %s682_s12, 4  ;;  %s600_s14 = int_to_ptr.vmem [resolvable:$false] %s599_s14 }
  0x36   : > { %s601_s15 = scalar_lea.vmem %s600_s14, 256  ;;  %p602_p5 = scmp.lt.s32.totalorder %s162_s26, %s600_s14 }
  0x37   : > { %p597_p6 = pnand %p595_p1, %p583_p7  ;;  %p603_p9 = scmp.lt.s32.totalorder %s601_s15, %s594_s13 }
  0x39   : > { %p598_p3 = pneg %p597_p6  ;;  %p604_p4 = por %p603_p9, %p602_p5 }
  0x3b   : > { %p605_p8 = pnand %p604_p4, %p598_p3 }
  0x3d   : > { %608 = shalt.err (!%p605_p8)
}
  0x3e   : > { %499 = dma.hbm_to_vmem [thread:$0]  (!%p800_p11), %s798_s21, 128, %s162_s26, %s151_s29  }
  0x3f   : > { %p903_p12 = scmp.ne.s32.totalorder %s898_s24, 0 }
  0x40   : > { %s821_s16 = sand.u32 (!%p903_p12), 1, %s669_s18   ;;  %p904_p1 = scmp.ne.s32.totalorder (!%p903_p12), %s896_s22, 0 }
  0x41   : > { %170 = sbr.rel (%p903_p12) target bundleno = 591 (0x24f), region = 32  ;;  %s439_s25 = sshll.u32 (!%p903_p12), %s821_s16, 3 }
  0x42   : > { %s173_s30 = scalar_lea.sflag (!%p903_p12), [#allocation5], %s821_s16  ;;  %s176_s5 = scalar_lea.vmem (!%p903_p12), [#allocation4], %s439_s25 }
  0x46   : > { %652 = dma.done.wait (%p904_p1), %s173_s30, 128  }
  0x47   : > { %654 = vsyncadd (%p904_p1), %s173_s30, 4294967168  ;;  %p905_p4 = scmp.eq.s32.totalorder %s735_s0, 0 }
  0x49   : > { %656 = dma.done.wait (%p905_p4), [#allocation8], 1024   ;;  %p906_p6 = pmov %p905_p4 }
  0x4a   : > { %v204_v0 = vld [vmem:[%s176_s5] sm:$0xff]  ;;  %v683_v2 = vmov 0.0   ;;  %v547_v4 = vld [vmem:[#allocation7 + $0x28] sm:$0xff]   ;;  %v209_v5 = vlaneseq  ;;  %v548_v12 = vld [vmem:[#allocation7 + $0x20] sm:$0xff]   ;;  %vm684_vm1 = vmmov 0   ;;  %s220_s22 = sld [smem:[#allocation3]] }
  0x4b   : > { %658 = vsyncadd (%p906_p6), [#allocation8], 4294966272  ;;  %205 = vadd.xlane.f32.xlu0 %v204_v0  ;;  %v545_v1 = vld [vmem:[#allocation7 + $0x38] sm:$0xff]   ;;  %464 = vmatprep.subr.bf16.mxu0 %v683_v2  ;;  %v546_v3 = vld [vmem:[#allocation7 + $0x30] sm:$0xff]   ;;  %s452_s26 = sshll.u32 %s735_s0, 7  ;;  %s202_s27 = scalar_lea.vmem [#allocation9], %s439_s25 }
  0x4c   : > { %465 = vmatpush3.bf16.msra.mxu0 %v545_v1  ;;  %v210_v6 = vand.u32 127, %v209_v5  ;;  %v549_v13 = vld [vmem:[#allocation7 + $0x18] sm:$0xff]   ;;  %480 = vmatprep.mubr.msk.bf16.mxu0 %vm684_vm1, %v683_v2  ;;  %v550_v14 = vld [vmem:[#allocation7 + $0x10] sm:$0xff]   ;;  %v551_v15 = vld [vmem:[#allocation7 + $0x8] sm:$0xff]   ;;  %s352_s29 = sshll.u32 %s202_s27, 4  ;;  %s844_s8 = scalar_lea.hbm %s891_s4, %s452_s26  ;;  %s846_s29 = int_to_ptr.vmem [resolvable:$true] %s352_s29 }
  0x4d   : > { %466 = vmatprep.subr.bf16.mxu0 %v683_v2  ;;  %v552_v16 = vld [vmem:[#allocation7] sm:$0xff]   ;;  %v442_v24 = vld [vmem:[%s890_s3] ss:$0 sm:$0xff]  ;;  %s339_s0 = scalar_lea.sflag [#allocation6], %s821_s16  ;;  %s609_s9 = scalar_lea.vmem %s846_s29, 128 }
  0x4e   : > { %vm211_vm0 = vcmp.lt.s32.totalorder %v210_v6, 32  ;;  %p610_p8 = scmp.ne.s32.totalorder %s846_s29, %s609_s9  ;;  %p907_p3 = scmp.ne.s32.totalorder %s901_s11, 0 }
  0x4f   : > { %s685_s13 = smov [#allocation9]  }
  0x50   : > { %467 = vmatpush3.bf16.msra.mxu0 %v546_v3  ;;  %v221_v19 = vstv %s220_s22  ;;  %p611_p11 = pnand %p610_p8, %p907_p3  ;;  %s613_s12 = sshll.u32 %s685_s13, 4  ;;  %s614_s12 = int_to_ptr.vmem [resolvable:$false] %s613_s12 }
  0x51   : > { %468 = vmatprep.subr.bf16.mxu0 %v683_v2  ;;  %s615_s14 = scalar_lea.vmem %s614_s12, 256  ;;  %p616_p10 = scmp.lt.s32.totalorder %s846_s29, %s614_s12 }
  0x52   : > { %p612_p7 = pneg %p611_p11  ;;  %p617_p2 = scmp.lt.s32.totalorder %s615_s14, %s609_s9 }
  0x54   : > { %469 = vmatpush3.bf16.msra.mxu0 %v547_v4  ;;  %p618_p13 = por %p617_p2, %p616_p10 }
  0x55   : > { %470 = vmatprep.subr.bf16.mxu0 %v683_v2 }
  0x56   : > { %p619_p0 = pnand %p618_p13, %p612_p7 }
  0x58   : > { %471 = vmatpush3.bf16.msra.mxu0 %v548_v12 }
  0x59   : > { %472 = vmatprep.subr.bf16.mxu0 %v683_v2 }
  0x5c   : > { %473 = vmatpush3.bf16.msra.mxu0 %v549_v13 }
  0x5d   : > { %474 = vmatprep.subr.bf16.mxu0 %v683_v2 }
  0x60   : > { %475 = vmatpush3.bf16.msra.mxu0 %v550_v14 }
  0x61   : > { %476 = vmatprep.subr.bf16.mxu0 %v683_v2 }
  0x64   : > { %477 = vmatpush3.bf16.msra.mxu0 %v551_v15 }
  0x65   : > { %478 = vmatprep.subr.bf16.mxu0 %v683_v2 }
  0x68   : > { %479 = vmatpush3.bf16.msra.mxu0 %v552_v16 }
  0xd4   : > { %v206_v7 = vpop.xlane.xlu0 %205 }
  0xd5   : > { %v207_v8 = vmul.f32 0.03125, %v206_v7 }
  0xd7   : > { %v208_v9 = vsub.f32 %v204_v0, %v207_v8 }
  0xd9   : > { %v214_v10 = vsel %vm211_vm0, %v208_v9, 0.0 }
  0xda   : > { %v215_v11 = vmul.f32 %v214_v10, %v214_v10 }
  0xdc   : > { %216 = vadd.xlane.f32.xlu0 %v215_v11 }
 0x165   : > { %v217_v17 = vpop.xlane.xlu0 %216 }
 0x166   : > { %v218_v18 = vmul.f32 0.032258064, %v217_v17 }
 0x168   : > { %553 = vrsqrt.f32 %v218_v18 }
 0x175   : > { %v554_v20 = vpop.eup %553 }
 0x176   : > { %v222_v21 = vmul.f32 %v554_v20, %v221_v19 }
 0x178   : > { %v223_v22 = vmul.f32 %v222_v21, %v214_v10 }
 0x17a   : > { %v224_v23 = vpack.c.bf16 %v223_v22, %v223_v22 }
 0x17c   : > { %481 = vmatmul.mubr.bf16.vlgmr.msra.gmra.mxu0 %v224_v23 }
 0x23c   : > { %v330_v25 = vpop.f32.mrf.mxu0 }
 0x23d   : > { %v331_v26 = vadd.f32 %v442_v24, %v330_v25 }
 0x23e   : > { %v482_v27 = vpop.f32.mrf.mxu0 }
 0x23f   : > { %v336_v28 = vadd.f32 %v331_v26, %v204_v0 }
 0x240   : > { %v333_v29 = vpop.f32.mrf.mxu0 }
 0x241   : > { %337 = vst [vmem:[%s202_s27] sm:$0xff] %v336_v28 }
 0x242   : > { %v483_v30 = vpop.f32.mrf.mxu0 }
 0x243   : > { %622 = shalt.err (!%p619_p0)
}
 0x244   : > { %s623_s15 = scalar_lea.hbm %s844_s8, 128  ;;  %s627_s30 = scalar_lea.hbm %s891_s4, 256 }
 0x245   : > { %p624_p5 = scmp.ne.s32.totalorder %s844_s8, %s623_s15  ;;  %p628_p1 = scmp.lt.s32.totalorder %s844_s8, %s891_s4 }
 0x246   : > { %p629_p4 = scmp.lt.s32.totalorder %s627_s30, %s623_s15 }
 0x247   : > { %p625_p9 = pnand %p624_p5, %p907_p3 }
 0x248   : > { %p630_p6 = por %p629_p4, %p628_p1 }
 0x249   : > { %p626_p12 = pneg %p625_p9 }
 0x24b   : > { %p631_p8 = pnand %p630_p6, %p626_p12 }
 0x24d   : > { %634 = shalt.err (!%p631_p8)
}
 0x24e   : > { %490 = dma.vmem_to_hbm [thread:$0]  (%p907_p3), %s846_s29, 128, %s844_s8, %s339_s0  }
 0x24f PF: > { %s364_s24 = sand.u32 1, %s665_s17   ;;  %p908_p11 = scmp.ne.s32.totalorder %s897_s23, 0 }
 0x250   : > { %p909_p7 = scmp.ge.s32.totalorder %s677_s20, 2  ;;  %s365_s21 = scalar_lea.sflag [#allocation6], %s364_s24 }
 0x252   : > { %p501_p10 = pnand %p909_p7, %p908_p11 }
 0x254   : > { %p502_p2 = pneg %p501_p10 }
 0x256   : > { %660 = dma.done.wait (%p502_p2), %s365_s21, 128  }
 0x257   : > { %662 = vsyncadd (%p502_p2), %s365_s21, 4294967168  ;;  %p19_p13 = scmp.ge.s32.totalorder %s768_s28, 4   ;;  %s910_s17 = smov %s669_s18 }
 0x258   : > { %s911_s18 = smov %s673_s19  ;;  %s912_s19 = smov %s785_s10 }
 0x259   : > { %s913_s20 = smov %s768_s28  ;;  %21 = sbr.rel (!%p19_p13) target bundleno = 8 (0x8), region = 81 }
 0x25e   :  { %370 = vsyncpa [#allocation5], 1 }
 0x25f   :  { %372 = vsyncpa [#allocation5 + $0x1], 1 }
 0x260   :  { %373 = vsyncpa [#allocation8], 1 }
 0x261   :  { %374 = vsyncpa [#allocation6], 1 }
 0x262   :  { %376 = vsyncpa [#allocation6 + $0x1], 1 }

// kernel: tpu_custom_call.1
= control target key start
LH: loop header
LB: loop body
LE: loop exit
PB: predicated region body
PF: predicated region fallthrough
CT: control target
= control target key end

     0   :  { %s887_s0 = inlined_call_operand.<no memory space> [shape: f32[1], index: 0, kind: input, shape index: {}]   ;;  %s888_s1 = inlined_call_operand.hbm [shape: f32[16,128], index: 1, kind: input, shape index: {}]   ;;  %s889_s2 = inlined_call_operand.hbm [shape: bf16[128,128], index: 2, kind: input, shape index: {}]   ;;  %s890_s3 = inlined_call_operand.vmem [shape: f32[1,128], index: 3, kind: input, shape index: {}]   ;;  %s891_s4 = inlined_call_operand.hbm [shape: f32[16,128], index: 4, kind: output, shape index: {}]  }
   0x1   :  { %9 = sst [smem:[#allocation3]] %s887_s0 }
   0x2   :  { %10 = vsyncpa [#allocation5], 0 }
   0x3   :  { %12 = vsyncpa [#allocation5 + $0x1], 0 }
   0x4   :  { %13 = vsyncpa [#allocation8], 0 }
   0x5   :  { %14 = vsyncpa [#allocation6], 0 }
   0x6   :  { %16 = vsyncpa [#allocation6 + $0x1], 0  ;;  %s714_s17 = smov 0   ;;  %s716_s18 = smov 0  }
   0x7   :  { %s718_s19 = smov 0   ;;  %s720_s20 = smov 0  }
   0x8 LB: > { %s735_s0 = sadd.s32 4294967295, %s677_s20   ;;  %s432_s21 = sadd.s32 4294967294, %s677_s20   ;;  %s677_s20 = sphi %s720_s20, %s913_s20   ;;  %s673_s19 = sphi %s718_s19, %s912_s19   ;;  %s669_s18 = sphi %s716_s18, %s911_s18   ;;  %s665_s17 = sphi %s714_s17, %s910_s17  }
   0x9   : > { %p42_p0 = scmp.ne.s32.totalorder %s669_s18, %s665_s17  ;;  %p892_p1 = scmp.eq.s32.totalorder %s735_s0, 0 }
   0xa   : > { %p114_p3 = scmp.eq.s32.totalorder %s432_s21, 1  ;;  %p433_p5 = scmp.ge.s32.totalorder %s677_s20, 1 }
   0xb   : > { %p744_p4 = por %p892_p1, %p42_p0  ;;  %p121_p7 = scmp.lt.s32.totalorder %s677_s20, 3 }
   0xc   : > { %p749_p6 = por %p114_p3, %p42_p0  ;;  %s679_s25 = smov [#allocation7]  }
   0xd   : > { %s896_s22 = scalar_select %p744_p4, 1, 0 }
   0xe   : > { %s897_s23 = scalar_select %p749_p6, 1, 0 }
   0xf   : > { %p754_p8 = pnand %p433_p5, %p121_p7  ;;  %s133_s26 = sshll.u32 %s679_s25, 4  ;;  %s134_s26 = int_to_ptr.vmem [resolvable:$true] %s133_s26 }
  0x10   : > { %s768_s28 = sadd.s32 1, %s677_s20   ;;  %s29_s29 = sadd.s32 1, %s673_s19 }
  0x11   : > { %s898_s24 = scalar_select %p754_p8, 1, 0 }
  0x12   : > { %p492_p9 = pneg %p754_p8  ;;  %s26_s30 = ssub.s32 %s677_s20, %s768_s28 }
  0x13   : > { %s566_s5 = scalar_lea.vmem %s134_s26, 1024  ;;  %p574_p5 = scmp.lt.s32.totalorder %s134_s26, %s134_s26 }
  0x14   : > { %p763_p11 = pnand %p492_p9, %p892_p1  ;;  %p567_p13 = scmp.ne.s32.totalorder %s134_s26, %s566_s5 }
  0x15   : > { %p575_p7 = scmp.lt.s32.totalorder %s566_s5, %s566_s5 }
  0x16   : > { %p557_p12 = pneg %p763_p11 }
  0x17   : > { %p576_p10 = por %p575_p7, %p574_p5 }
  0x18   : > { %p569_p0 = pnand %p567_p13, %p557_p12 }
  0x1a   : > { %p570_p3 = pneg %p569_p0 }
  0x1c   : > { %p577_p2 = pnand %p576_p10, %p570_p3 }
  0x1e   : > { %580 = shalt.err (!%p577_p2)
}
  0x1f   : > { %s680_s6 = smov 64   ;;  %s681_s7 = smov 4  }
  0x20   : > { %495 = dma.hbm_to_vmem [thread:$0]  (!%p763_p11), %s889_s2, 1024, %s134_s26, [#allocation8], %s680_s6, %s680_s6, %s681_s7  }
  0x21   : > { %p27_p9 = scmp.eq.s32.totalorder %s26_s30, 0  ;;  %p36_p12 = scmp.ne.s32.totalorder %s673_s19, %s669_s18 }
  0x22   : > { %p37_p10 = scmp.eq.s32.totalorder %s677_s20, 0  ;;  %p505_p2 = scmp.lt.s32.totalorder %s677_s20, 2 }
  0x23   : > { %s785_s10 = scalar_select %p27_p9, %s673_s19, %s29_s29  }
  0x24   : > { %p38_p13 = por %p37_p10, %p36_p12  ;;  %p900_p0 = scmp.eq.s32.totalorder %s735_s0, 1 }
  0x25   : > { %s150_s12 = sand.u32 1, %s673_s19   ;;  %s437_s13 = sshll.u32 %s677_s20, 7 }
  0x26   : > { %p789_p3 = por %p900_p0, %p36_p12  ;;  %s436_s14 = sshll.u32 %s150_s12, 3 }
  0x27   : > { %s798_s21 = scalar_lea.hbm %s888_s1, %s437_s13  ;;  %s154_s25 = scalar_lea.vmem [#allocation4], %s436_s14 }
  0x28   : > { %s901_s11 = scalar_select %p789_p3, 1, 0 }
  0x29   : > { %s161_s26 = sshll.u32 %s154_s25, 4  ;;  %p800_p11 = pnand %p505_p2, %p38_p13  ;;  %s162_s26 = int_to_ptr.vmem [resolvable:$true] %s161_s26 }
  0x2a   : > { %s151_s29 = scalar_lea.sflag [#allocation5], %s150_s12  ;;  %s581_s30 = scalar_lea.hbm %s798_s21, 128 }
  0x2b   : > { %p582_p5 = scmp.ne.s32.totalorder %s798_s21, %s581_s30  ;;  %p583_p7 = pneg %p800_p11 }
  0x2c   : > { %s586_s7 = scalar_lea.hbm %s888_s1, 256  ;;  %p587_p10 = scmp.lt.s32.totalorder %s798_s21, %s888_s1 }
  0x2d   : > { %p584_p9 = pnand %p583_p7, %p582_p5  ;;  %p588_p2 = scmp.lt.s32.totalorder %s586_s7, %s581_s30 }
  0x2f   : > { %p585_p12 = pneg %p584_p9  ;;  %p589_p13 = por %p588_p2, %p587_p10 }
  0x31   : > { %p590_p0 = pnand %p589_p13, %p585_p12 }
  0x33   : > { %593 = shalt.err (!%p590_p0)
}
  0x34   : > { %s594_s13 = scalar_lea.vmem %s162_s26, 128  ;;  %s682_s12 = smov [#allocation4]  }
  0x35   : > { %p595_p1 = scmp.ne.s32.totalorder %s162_s26, %s594_s13  ;;  %s599_s14 = sshll.u32 %s682_s12, 4  ;;  %s600_s14 = int_to_ptr.vmem [resolvable:$false] %s599_s14 }
  0x36   : > { %s601_s15 = scalar_lea.vmem %s600_s14, 256  ;;  %p602_p5 = scmp.lt.s32.totalorder %s162_s26, %s600_s14 }
  0x37   : > { %p597_p6 = pnand %p595_p1, %p583_p7  ;;  %p603_p9 = scmp.lt.s32.totalorder %s601_s15, %s594_s13 }
  0x39   : > { %p598_p3 = pneg %p597_p6  ;;  %p604_p4 = por %p603_p9, %p602_p5 }
  0x3b   : > { %p605_p8 = pnand %p604_p4, %p598_p3 }
  0x3d   : > { %608 = shalt.err (!%p605_p8)
}
  0x3e   : > { %499 = dma.hbm_to_vmem [thread:$0]  (!%p800_p11), %s798_s21, 128, %s162_s26, %s151_s29  }
  0x3f   : > { %p903_p12 = scmp.ne.s32.totalorder %s898_s24, 0 }
  0x40   : > { %s821_s16 = sand.u32 (!%p903_p12), 1, %s669_s18   ;;  %p904_p1 = scmp.ne.s32.totalorder (!%p903_p12), %s896_s22, 0 }
  0x41   : > { %170 = sbr.rel (%p903_p12) target bundleno = 591 (0x24f), region = 32  ;;  %s439_s25 = sshll.u32 (!%p903_p12), %s821_s16, 3 }
  0x42   : > { %s173_s30 = scalar_lea.sflag (!%p903_p12), [#allocation5], %s821_s16  ;;  %s176_s5 = scalar_lea.vmem (!%p903_p12), [#allocation4], %s439_s25 }
  0x46   : > { %652 = dma.done.wait (%p904_p1), %s173_s30, 128  }
  0x47   : > { %654 = vsyncadd (%p904_p1), %s173_s30, 4294967168  ;;  %p905_p4 = scmp.eq.s32.totalorder %s735_s0, 0 }
  0x49   : > { %656 = dma.done.wait (%p905_p4), [#allocation8], 1024   ;;  %p906_p6 = pmov %p905_p4 }
  0x4a   : > { %v204_v0 = vld [vmem:[%s176_s5] sm:$0xff]  ;;  %v683_v2 = vmov 0.0   ;;  %v547_v4 = vld [vmem:[#allocation7 + $0x28] sm:$0xff]   ;;  %v209_v5 = vlaneseq  ;;  %v548_v12 = vld [vmem:[#allocation7 + $0x20] sm:$0xff]   ;;  %vm684_vm1 = vmmov 0   ;;  %s220_s22 = sld [smem:[#allocation3]] }
  0x4b   : > { %658 = vsyncadd (%p906_p6), [#allocation8], 4294966272  ;;  %205 = vadd.xlane.f32.xlu0 %v204_v0  ;;  %v545_v1 = vld [vmem:[#allocation7 + $0x38] sm:$0xff]   ;;  %464 = vmatprep.subr.bf16.mxu0 %v683_v2  ;;  %v546_v3 = vld [vmem:[#allocation7 + $0x30] sm:$0xff]   ;;  %s452_s26 = sshll.u32 %s735_s0, 7  ;;  %s202_s27 = scalar_lea.vmem [#allocation9], %s439_s25 }
  0x4c   : > { %465 = vmatpush3.bf16.msra.mxu0 %v545_v1  ;;  %v210_v6 = vand.u32 127, %v209_v5  ;;  %v549_v13 = vld [vmem:[#allocation7 + $0x18] sm:$0xff]   ;;  %480 = vmatprep.mubr.msk.bf16.mxu0 %vm684_vm1, %v683_v2  ;;  %v550_v14 = vld [vmem:[#allocation7 + $0x10] sm:$0xff]   ;;  %v551_v15 = vld [vmem:[#allocation7 + $0x8] sm:$0xff]   ;;  %s352_s29 = sshll.u32 %s202_s27, 4  ;;  %s844_s8 = scalar_lea.hbm %s891_s4, %s452_s26  ;;  %s846_s29 = int_to_ptr.vmem [resolvable:$true] %s352_s29 }
  0x4d   : > { %466 = vmatprep.subr.bf16.mxu0 %v683_v2  ;;  %v552_v16 = vld [vmem:[#allocation7] sm:$0xff]   ;;  %v442_v24 = vld [vmem:[%s890_s3] ss:$0 sm:$0xff]  ;;  %s339_s0 = scalar_lea.sflag [#allocation6], %s821_s16  ;;  %s609_s9 = scalar_lea.vmem %s846_s29, 128 }
  0x4e   : > { %vm211_vm0 = vcmp.lt.s32.totalorder %v210_v6, 32  ;;  %p610_p8 = scmp.ne.s32.totalorder %s846_s29, %s609_s9  ;;  %p907_p3 = scmp.ne.s32.totalorder %s901_s11, 0 }
  0x4f   : > { %s685_s13 = smov [#allocation9]  }
  0x50   : > { %467 = vmatpush3.bf16.msra.mxu0 %v546_v3  ;;  %v221_v19 = vstv %s220_s22  ;;  %p611_p11 = pnand %p610_p8, %p907_p3  ;;  %s613_s12 = sshll.u32 %s685_s13, 4  ;;  %s614_s12 = int_to_ptr.vmem [resolvable:$false] %s613_s12 }
  0x51   : > { %468 = vmatprep.subr.bf16.mxu0 %v683_v2  ;;  %s615_s14 = scalar_lea.vmem %s614_s12, 256  ;;  %p616_p10 = scmp.lt.s32.totalorder %s846_s29, %s614_s12 }
  0x52   : > { %p612_p7 = pneg %p611_p11  ;;  %p617_p2 = scmp.lt.s32.totalorder %s615_s14, %s609_s9 }
  0x54   : > { %469 = vmatpush3.bf16.msra.mxu0 %v547_v4  ;;  %p618_p13 = por %p617_p2, %p616_p10 }
  0x55   : > { %470 = vmatprep.subr.bf16.mxu0 %v683_v2 }
  0x56   : > { %p619_p0 = pnand %p618_p13, %p612_p7 }
  0x58   : > { %471 = vmatpush3.bf16.msra.mxu0 %v548_v12 }
  0x59   : > { %472 = vmatprep.subr.bf16.mxu0 %v683_v2 }
  0x5c   : > { %473 = vmatpush3.bf16.msra.mxu0 %v549_v13 }
  0x5d   : > { %474 = vmatprep.subr.bf16.mxu0 %v683_v2 }
  0x60   : > { %475 = vmatpush3.bf16.msra.mxu0 %v550_v14 }
  0x61   : > { %476 = vmatprep.subr.bf16.mxu0 %v683_v2 }
  0x64   : > { %477 = vmatpush3.bf16.msra.mxu0 %v551_v15 }
  0x65   : > { %478 = vmatprep.subr.bf16.mxu0 %v683_v2 }
  0x68   : > { %479 = vmatpush3.bf16.msra.mxu0 %v552_v16 }
  0xd4   : > { %v206_v7 = vpop.xlane.xlu0 %205 }
  0xd5   : > { %v207_v8 = vmul.f32 0.03125, %v206_v7 }
  0xd7   : > { %v208_v9 = vsub.f32 %v204_v0, %v207_v8 }
  0xd9   : > { %v214_v10 = vsel %vm211_vm0, %v208_v9, 0.0 }
  0xda   : > { %v215_v11 = vmul.f32 %v214_v10, %v214_v10 }
  0xdc   : > { %216 = vadd.xlane.f32.xlu0 %v215_v11 }
 0x165   : > { %v217_v17 = vpop.xlane.xlu0 %216 }
 0x166   : > { %v218_v18 = vmul.f32 0.032258064, %v217_v17 }
 0x168   : > { %553 = vrsqrt.f32 %v218_v18 }
 0x175   : > { %v554_v20 = vpop.eup %553 }
 0x176   : > { %v222_v21 = vmul.f32 %v554_v20, %v221_v19 }
 0x178   : > { %v223_v22 = vmul.f32 %v222_v21, %v214_v10 }
 0x17a   : > { %v224_v23 = vpack.c.bf16 %v223_v22, %v223_v22 }
 0x17c   : > { %481 = vmatmul.mubr.bf16.vlgmr.msra.gmra.mxu0 %v224_v23 }
 0x23c   : > { %v330_v25 = vpop.f32.mrf.mxu0 }
 0x23d   : > { %v331_v26 = vadd.f32 %v442_v24, %v330_v25 }
 0x23e   : > { %v482_v27 = vpop.f32.mrf.mxu0 }
 0x23f   : > { %v336_v28 = vadd.f32 %v331_v26, %v204_v0 }
 0x240   : > { %v333_v29 = vpop.f32.mrf.mxu0 }
 0x241   : > { %337 = vst [vmem:[%s202_s27] sm:$0xff] %v336_v28 }
 0x242   : > { %v483_v30 = vpop.f32.mrf.mxu0 }
 0x243   : > { %622 = shalt.err (!%p619_p0)
}
 0x244   : > { %s623_s15 = scalar_lea.hbm %s844_s8, 128  ;;  %s627_s30 = scalar_lea.hbm %s891_s4, 256 }
 0x245   : > { %p624_p5 = scmp.ne.s32.totalorder %s844_s8, %s623_s15  ;;  %p628_p1 = scmp.lt.s32.totalorder %s844_s8, %s891_s4 }
 0x246   : > { %p629_p4 = scmp.lt.s32.totalorder %s627_s30, %s623_s15 }
 0x247   : > { %p625_p9 = pnand %p624_p5, %p907_p3 }
 0x248   : > { %p630_p6 = por %p629_p4, %p628_p1 }
 0x249   : > { %p626_p12 = pneg %p625_p9 }
 0x24b   : > { %p631_p8 = pnand %p630_p6, %p626_p12 }
 0x24d   : > { %634 = shalt.err (!%p631_p8)
}
 0x24e   : > { %490 = dma.vmem_to_hbm [thread:$0]  (%p907_p3), %s846_s29, 128, %s844_s8, %s339_s0  }
 0x24f PF: > { %s364_s24 = sand.u32 1, %s665_s17   ;;  %p908_p11 = scmp.ne.s32.totalorder %s897_s23, 0 }
 0x250   : > { %p909_p7 = scmp.ge.s32.totalorder %s677_s20, 2  ;;  %s365_s21 = scalar_lea.sflag [#allocation6], %s364_s24 }
 0x252   : > { %p501_p10 = pnand %p909_p7, %p908_p11 }
 0x254   : > { %p502_p2 = pneg %p501_p10 }
 0x256   : > { %660 = dma.done.wait (%p502_p2), %s365_s21, 128  }
 0x257   : > { %662 = vsyncadd (%p502_p2), %s365_s21, 4294967168  ;;  %p19_p13 = scmp.ge.s32.totalorder %s768_s28, 4   ;;  %s910_s17 = smov %s669_s18 }
 0x258   : > { %s911_s18 = smov %s673_s19  ;;  %s912_s19 = smov %s785_s10 }
 0x259   : > { %s913_s20 = smov %s768_s28  ;;  %21 = sbr.rel (!%p19_p13) target bundleno = 8 (0x8), region = 81 }
 0x25e   :  { %370 = vsyncpa [#allocation5], 1 }
 0x25f   :  { %372 = vsyncpa [#allocation5 + $0x1], 1 }
 0x260   :  { %373 = vsyncpa [#allocation8], 1 }
 0x261   :  { %374 = vsyncpa [#allocation6], 1 }
 0x262   :  { %376 = vsyncpa [#allocation6 + $0x1], 1 }

</bundles_post_ra>
